<compile_context>
chip_gen: v7x
topology: tpu7x:2x2x1
jax: 0.10.0
libtpu: 0.0.40
codegen_flags: <defaults>
</compile_context>

<pallas_src>
import functools

import jax
import jax.numpy as jnp
from jax import lax
from jax.experimental import pallas as pl
from jax.experimental.pallas import tpu as pltpu


# --------------------------------------------------------------------------- #
# Kernel
# --------------------------------------------------------------------------- #
def _multi_order_kernel(adj_ref, *out_refs, order: int, row_tile: int,
                        compute_dtype):
    # adj_ref block : (B, N, N)   -- B full graphs, resident across row tiles
    # out_refs[k]   : (B, TR, N)  -- rows [r*TR, (r+1)*TR) of power k+1
    n = adj_ref.shape[-1]
    tr = row_tile
    r = pl.program_id(1)
    row0 = pl.multiple_of(r * tr, tr)

    g = adj_ref[...]                                 # (B, N, N), RHS of every matmul
    if tr == n:
        g_rows = g                                   # no row tiling
    else:
        g_rows = adj_ref[:, pl.ds(row0, tr), :]      # (B, TR, N), LHS row stripe

    # Zero-diagonal mask for this row tile, built in-kernel (cheap VPU work).
    rows = lax.broadcasted_iota(jnp.int32, (tr, n), 0) + row0
    cols = lax.broadcasted_iota(jnp.int32, (tr, n), 1)
    keep = (rows != cols)[None]                      # (1, TR, N), broadcasts over B

    # Order 1: masked adjacency rows, no dtype round-trips.
    out_refs[0][...] = jnp.where(
        keep, g_rows, jnp.zeros_like(g_rows)).astype(out_refs[0].dtype)

    if order > 1:
        cd = jnp.dtype(compute_dtype)
        g_c = g if g.dtype == cd else g.astype(cd)               # MXU RHS operand
        k_rows = g_rows if g_rows.dtype == cd else g_rows.astype(cd)
        for i in range(1, order):                                # static Python loop
            k_f32 = jnp.einsum("brj,bjk->brk", k_rows, g_c,
                               preferred_element_type=jnp.float32)
            out_refs[i][...] = jnp.where(keep, k_f32, 0.0).astype(out_refs[i].dtype)
            if i + 1 < order:
                k_rows = k_f32 if cd == jnp.dtype(jnp.float32) else k_f32.astype(cd)


# --------------------------------------------------------------------------- #
# VMEM budgeting / tiling choice
# --------------------------------------------------------------------------- #
def _vmem_capacity_bytes() -> int:
    try:
        info = pltpu.get_tpu_info()
        cap = getattr(info, "vmem_capacity_bytes", None)
        if cap:
            return int(cap)
    except Exception:
        pass
    return 64 << 20  # conservative fallback (v7x per-core VMEM)


def _step_vmem_bytes(B, TR, N, order, in_isz, out_isz, cd_size):
    """Estimated VMEM per grid step: double-buffered pipeline blocks + in-kernel temps."""
    pipeline = 2 * B * N * N * in_isz + 2 * order * B * TR * N * out_isz
    temps = B * N * N * (in_isz + (cd_size if cd_size != in_isz else 0))  # g (+ cast copy)
    temps += B * TR * N * (cd_size + 4 + out_isz)   # LHS rows, f32 result, store temp
    return pipeline + temps


def _choose_tiling(G, N, order, in_isz, out_isz, cd_size, budget, two_cores):
    def fits(B, TR):
        return _step_vmem_bytes(B, TR, N, order, in_isz, out_isz, cd_size) <= budget

    divisors = [b for b in range(1, G + 1) if G % b == 0]
    full = [b for b in divisors if fits(b, N)]
    if full:
        if two_cores:
            even = [b for b in full if (G // b) >= 2 and (G // b) % 2 == 0]
            ge2 = [b for b in full if (G // b) >= 2]
            if even:
                return max(even), N
            if ge2:
                return max(ge2), N
        return max(full), N

    # Row-tiling fallback (large N): one graph per step, tile the power-chain rows.
    row_tiles = sorted((t for t in range(8, N, 8) if N % t == 0), reverse=True)
    for t in row_tiles:
        if fits(1, t):
            return 1, t
    # TODO(synk): also tile the contraction dimension when a single (N, N)
    # graph plus one row stripe still exceeds VMEM.
    return 1, (min(row_tiles) if row_tiles else N)


# --------------------------------------------------------------------------- #
# Wrapper
# --------------------------------------------------------------------------- #
def multi_order(adj: jax.Array, order: int = 2, *, compute_dtype=None,
                out_dtype=None, block_graphs: int | None = None,
                row_tile: int | None = None):
    """adj: (G, N, N). Returns a list of `order` arrays, each (G, N, N)."""
    G, N, N2 = adj.shape
    assert N == N2, "adjacency matrices must be square"
    assert order >= 1

    # Defaults keep strict parity with the reference; pass compute_dtype=bf16
    # (and/or out_dtype=bf16) explicitly for the MXU-native / half-writeback path.
    if compute_dtype is None:
        compute_dtype = adj.dtype
    if out_dtype is None:
        out_dtype = adj.dtype

    in_isz = jnp.dtype(adj.dtype).itemsize
    out_isz = jnp.dtype(out_dtype).itemsize
    cd_size = jnp.dtype(compute_dtype).itemsize

    vmem_cap = _vmem_capacity_bytes()
    two_cores = vmem_cap <= (64 << 20)          # v7x-like: 2 TCs, 64 MiB each
    budget = int(vmem_cap * 0.7)                # headroom for compiler scratch

    B, TR = _choose_tiling(G, N, order, in_isz, out_isz, cd_size, budget, two_cores)
    if block_graphs is not None:
        B = block_graphs
    if row_tile is not None:
        TR = row_tile
    assert G % B == 0, "block_graphs must divide the number of graphs"
    assert N % TR == 0, "row_tile must divide N"

    grid = (G // B, N // TR)
    step_bytes = _step_vmem_bytes(B, TR, N, order, in_isz, out_isz, cd_size)
    vmem_limit = int(min(vmem_cap, max(step_bytes + (2 << 20), 32 << 20)))

    kernel = functools.partial(_multi_order_kernel, order=order, row_tile=TR,
                               compute_dtype=compute_dtype)

    out_shapes = tuple(jax.ShapeDtypeStruct((G, N, N), out_dtype)
                       for _ in range(order))
    out_specs = [pl.BlockSpec((B, TR, N), lambda i, r: (i, r, 0))
                 for _ in range(order)]

    outs = pl.pallas_call(
        kernel,
        out_shape=out_shapes,
        grid_spec=pltpu.PrefetchScalarGridSpec(
            num_scalar_prefetch=0,
            grid=grid,
            in_specs=[pl.BlockSpec((B, N, N), lambda i, r: (i, 0, 0))],
            out_specs=out_specs,
        ),
        compiler_params=pltpu.CompilerParams(
            dimension_semantics=("parallel", "arbitrary"),
            vmem_limit_bytes=vmem_limit,
        ),
    )(adj)
    return list(outs)


def multi_order_nested(adj: jax.Array, order: int = 2):
    """Mirror the PyTorch return structure: list over graphs of list over orders."""
    stacked = multi_order(adj, order=order)     # list of (G, N, N)
    G = adj.shape[0]
    return [[stacked[k][g] for k in range(order)] for g in range(G)]


def _reference(adj: jax.Array, order: int = 2):
    N = adj.shape[1]
    mask = 1.0 - jnp.eye(N, dtype=adj.dtype)
    outs = []
    k_pow = adj
    outs.append(k_pow * mask)
    for _ in range(1, order):
        k_pow = jnp.matmul(k_pow, adj)
        outs.append(k_pow * mask)
    return outs


if __name__ == "__main__":
    key = jax.random.PRNGKey(0)
    G, N, ORDER = 4, 16, 2
    adj = jax.random.uniform(key, (G, N, N), dtype=jnp.float32)

    # f32 path (default): parity with the pure-JAX reference.
    outs = [jax.block_until_ready(o) for o in multi_order(adj, order=ORDER)]
    refs = _reference(adj, order=ORDER)
    for o, r in zip(outs, refs):
        assert o.shape == r.shape and o.dtype == r.dtype
        assert jnp.allclose(o, r, atol=1e-3, rtol=1e-3), "f32 mismatch vs reference"

    # Exercise the row-tiled fallback path explicitly (TR < N).
    outs_rt = [jax.block_until_ready(o)
               for o in multi_order(adj, order=ORDER, block_graphs=1, row_tile=8)]
    for o, r in zip(outs_rt, refs):
        assert jnp.allclose(o, r, atol=1e-3, rtol=1e-3), "row-tiled mismatch"

    # bf16-operand / f32-accumulate path, deeper power chain (order=3).
    adj_bf16 = adj.astype(jnp.bfloat16)
    outs3 = [jax.block_until_ready(o)
             for o in multi_order(adj_bf16, order=3, compute_dtype=jnp.bfloat16)]
    refs3 = _reference(adj_bf16.astype(jnp.float32), order=3)
    for o, r in zip(outs3, refs3):
        assert o.shape == r.shape
        assert jnp.allclose(o.astype(jnp.float32), r, atol=0.1, rtol=5e-2), \
            "bf16 mismatch vs reference"

    # PyTorch-shaped nested return structure.
    nested = multi_order_nested(adj, order=ORDER)
    assert len(nested) == G and len(nested[0]) == ORDER
    assert nested[0][0].shape == (N, N)

    print("KERNEL_OK")
</pallas_src>

<mosaic_0001>
module attributes {stable_mosaic.version = 11 : i64} {
  func.func @_multi_order_kernel(%arg0: i32, %arg1: i32, %arg2: memref<2x16x16xf32, #tpu.memory_space<vmem>>, %arg3: memref<2x16x16xf32, #tpu.memory_space<vmem>>, %arg4: memref<2x16x16xf32, #tpu.memory_space<vmem>>) attributes {dimension_semantics = [#tpu.dimension_semantics<parallel>, #tpu.dimension_semantics<arbitrary>], iteration_bounds = array<i64: 2, 1>, scalar_prefetch = 0 : i64, scratch_operands = 0 : i64, tpu.core_type = #tpu.core_type<tc>, window_params = [{transform_indices = @transform_0, window_bounds = array<i64: 2, 16, 16>}, {transform_indices = @transform_1, window_bounds = array<i64: 2, 16, 16>}, {transform_indices = @transform_2, window_bounds = array<i64: 2, 16, 16>}]} {
    %c16_i32 = arith.constant 16 : i32
    %0 = arith.muli %arg1, %c16_i32 : i32
    %1 = tpu.assume_multiple %0, 16 : i32
    %c0 = arith.constant 0 : index
    %c0_0 = arith.constant 0 : index
    %c0_1 = arith.constant 0 : index
    %2 = vector.load %arg2[%c0, %c0_0, %c0_1] : memref<2x16x16xf32, #tpu.memory_space<vmem>>, vector<2x16x16xf32>
    %3 = tpu.iota {dimensions = array<i32: 0>} : vector<16x16xi32>
    %4 = vector.broadcast %1 : i32 to vector<16x16xi32>
    %5 = arith.addi %3, %4 : vector<16x16xi32>
    %6 = tpu.iota {dimensions = array<i32: 1>} : vector<16x16xi32>
    %7 = arith.cmpi ne, %5, %6 : vector<16x16xi32>
    %8 = vector.shape_cast %7 : vector<16x16xi1> to vector<1x16x16xi1>
    %cst = arith.constant 0.000000e+00 : f32
    %9 = vector.broadcast %cst : f32 to vector<2x16x16xf32>
    %10 = vector.shape_cast %8 : vector<1x16x16xi1> to vector<1x16x16xi1>
    %11 = vector.broadcast %10 : vector<1x16x16xi1> to vector<2x16x16xi1>
    %12 = arith.select %11, %2, %9 : vector<2x16x16xi1>, vector<2x16x16xf32>
    %c0_2 = arith.constant 0 : index
    %c0_3 = arith.constant 0 : index
    %c0_4 = arith.constant 0 : index
    %13 = vector.load %arg3[%c0_2, %c0_3, %c0_4] : memref<2x16x16xf32, #tpu.memory_space<vmem>>, vector<2x16x16xf32>
    tpu.vector_store %arg3[%c0_2, %c0_3, %c0_4], %12 {strides = array<i32>} : memref<2x16x16xf32, #tpu.memory_space<vmem>>, vector<2x16x16xf32>,
    "tpu.trace_start"() <{level = 10 : i32, message = "brj,bjk->brk"}> : () -> ()
    %cst_5 = arith.constant dense<0.000000e+00> : vector<2x16x16xf32>
    %14 = tpu.matmul %2, %2, %cst_5 {dimension_numbers = #tpu.dot_dimension_numbers<[2], [1], [1], [2], [0, 0, 0, 1, 1, 2], [0], [0]>} : vector<2x16x16xf32>, vector<2x16x16xf32>, vector<2x16x16xf32> -> vector<2x16x16xf32>
    %cst_6 = arith.constant 0.000000e+00 : f32
    "tpu.trace_stop"() : () -> ()
    %15 = vector.shape_cast %8 : vector<1x16x16xi1> to vector<1x16x16xi1>
    %16 = vector.broadcast %15 : vector<1x16x16xi1> to vector<2x16x16xi1>
    %17 = vector.broadcast %cst_6 : f32 to vector<2x16x16xf32>
    %18 = arith.select %16, %14, %17 : vector<2x16x16xi1>, vector<2x16x16xf32>
    %c0_7 = arith.constant 0 : index
    %c0_8 = arith.constant 0 : index
    %c0_9 = arith.constant 0 : index
    %19 = vector.load %arg4[%c0_7, %c0_8, %c0_9] : memref<2x16x16xf32, #tpu.memory_space<vmem>>, vector<2x16x16xf32>
    tpu.vector_store %arg4[%c0_7, %c0_8, %c0_9], %18 {strides = array<i32>} : memref<2x16x16xf32, #tpu.memory_space<vmem>>, vector<2x16x16xf32>,
    return
  }
  func.func @transform_0(%arg0: i32, %arg1: i32) -> (i32, i32, i32) {
    %c0_i32 = arith.constant 0 : i32
    %c0_i32_0 = arith.constant 0 : i32
    %c0_i32_1 = arith.constant 0 : i32
    return %arg0, %c0_i32, %c0_i32_0 : i32, i32, i32
  }
  func.func @transform_1(%arg0: i32, %arg1: i32) -> (i32, i32, i32) {
    %c0_i32 = arith.constant 0 : i32
    %c0_i32_0 = arith.constant 0 : i32
    return %arg0, %arg1, %c0_i32 : i32, i32, i32
  }
  func.func @transform_2(%arg0: i32, %arg1: i32) -> (i32, i32, i32) {
    %c0_i32 = arith.constant 0 : i32
    %c0_i32_0 = arith.constant 0 : i32
    return %arg0, %arg1, %c0_i32 : i32, i32, i32
  }
}

</mosaic_0001>

<bundles_post_ra>
// kernel: tpu_custom_call.1
= control target key start
LH: loop header
LB: loop body
LE: loop exit
PB: predicated region body
PF: predicated region fallthrough
CT: control target
= control target key end

     0   :  { %8 = vsyncpa [#allocation3], 0  ;;  %s1122_s0 = inlined_call_operand.hbm [shape: f32[4,16,16], index: 0, kind: input, shape index: {}]   ;;  %s1123_s1 = inlined_call_operand.hbm [shape: f32[4,16,16], index: 1, kind: output, shape index: {0}]   ;;  %s1124_s2 = inlined_call_operand.hbm [shape: f32[4,16,16], index: 2, kind: output, shape index: {1}]  }
   0x1   :  { %10 = vsyncpa [#allocation3 + $0x1], 0 }
   0x2   :  { %11 = vsyncpa [#allocation4], 0 }
   0x3   :  { %13 = vsyncpa [#allocation4 + $0x1], 0 }
   0x4   :  { %14 = vsyncpa [#allocation7], 0 }
   0x5   :  { %16 = vsyncpa [#allocation7 + $0x1], 0  ;;  %s854_s9 = smov 0   ;;  %s856_s10 = smov 0  }
   0x6   :  { %s858_s11 = smov 0   ;;  %s860_s12 = smov 0  }
   0x7   :  { %s862_s13 = smov 0   ;;  %s864_s14 = smov 0  }
   0x8 LB: > { %s553_s15 = sadd.s32 4294967295, %s830_s14   ;;  %s554_s16 = sadd.s32 4294967294, %s830_s14   ;;  %s830_s14 = sphi %s864_s14, %s22_s14   ;;  %s826_s13 = sphi %s862_s13, %s1139_s13   ;;  %s822_s12 = sphi %s860_s12, %s1138_s12   ;;  %s818_s11 = sphi %s858_s11, %s1137_s11   ;;  %s814_s10 = sphi %s856_s10, %s1136_s10   ;;  %s810_s9 = sphi %s854_s9, %s1135_s9  }
   0x9   : > { %s34_s17 = sadd.s32 1, %s826_s13  ;;  %s41_s18 = sadd.s32 1, %s818_s11 }
   0xa   : > { %p36_p0 = scmp.ge.s32.totalorder %s34_s17, 2  ;;  %p48_p1 = scmp.ne.s32.totalorder %s818_s11, %s814_s10 }
   0xb   : > { %p49_p2 = scmp.eq.s32.totalorder %s830_s14, 0  ;;  %p54_p3 = scmp.ne.s32.totalorder %s814_s10, %s810_s9 }
   0xc   : > { %s1141_s17 = smov (%p36_p0, %s34_s17), 0  ;;  %p55_p5 = scmp.eq.s32.totalorder %s553_s15, 0 }
   0xd   : > { %p895_p4 = por %p49_p2, %p48_p1  ;;  %s38_s20 = ssub.s32 %s826_s13, %s1141_s17 }
   0xe   : > { %p80_p6 = scmp.eq.s32.totalorder %s553_s15, 1  ;;  %p39_p7 = scmp.eq.s32.totalorder %s38_s20, 0 }
   0xf   : > { %p901_p8 = por %p55_p5, %p54_p3  ;;  %p86_p10 = scmp.eq.s32.totalorder %s554_s16, 1 }
  0x10   : > { %p905_p9 = por %p80_p6, %p48_p1  ;;  %p632_p13 = scmp.lt.s32.totalorder %s830_s14, 2 }
  0x11   : > { %s910_s23 = scalar_select %p39_p7, %s818_s11, %s41_s18  }
  0x12   : > { %s1128_s22 = scalar_select %p905_p9, 1, 0 }
  0x13   : > { %p912_p11 = por %p86_p10, %p54_p3  ;;  %s134_s25 = sand.u32 1, %s818_s11  }
  0x14   : > { %s557_s26 = sshll.u32 %s134_s25, 5  ;;  %s580_s27 = sshll.u32 %s826_s13, 9 }
  0x15   : > { %s1129_s24 = scalar_select %p912_p11, 1, 0 }
  0x16   : > { %s923_s30 = scalar_lea.hbm %s1122_s0, %s580_s27  ;;  %s138_s3 = scalar_lea.vmem [#allocation2], %s557_s26 }
  0x17   : > { %s146_s4 = sshll.u32 %s138_s3, 4  ;;  %p929_p0 = pnand %p632_p13, %p895_p4  ;;  %s925_s4 = int_to_ptr.vmem [resolvable:$true] %s146_s4 }
  0x18   : > { %s934_s6 = scalar_lea.sflag [#allocation3], %s134_s25  ;;  %s686_s7 = scalar_lea.hbm %s923_s30, 512 }
  0x19   : > { %p687_p2 = scmp.ne.s32.totalorder %s923_s30, %s686_s7  ;;  %p688_p3 = pneg %p929_p0 }
  0x1a   : > { %s691_s16 = scalar_lea.hbm %s1122_s0, 1024  ;;  %p692_p4 = scmp.lt.u32.totalorder %s923_s30, %s1122_s0 }
  0x1b   : > { %p689_p5 = pnand %p688_p3, %p687_p2  ;;  %p693_p7 = scmp.lt.u32.totalorder %s691_s16, %s686_s7 }
  0x1c   : > { %p695_p13 = scmp.lt.u32.totalorder %s686_s7, %s923_s30 }
  0x1d   : > { %p690_p6 = pneg %p689_p5  ;;  %p694_p10 = por %p693_p7, %p692_p4 }
  0x1f   : > { %p696_p12 = por %p695_p13, %p694_p10 }
  0x21   : > { %p697_p1 = pnand %p696_p12, %p690_p6 }
  0x23   : > { %700 = shalt.err (!%p697_p1)
}
  0x24   : > { %s701_s20 = scalar_lea.vmem %s925_s4, 512  ;;  %s832_s25 = smov [#allocation2]  }
  0x25   : > { %p702_p2 = scmp.ne.s32.totalorder %s925_s4, %s701_s20  ;;  %s706_s26 = sshll.u32 %s832_s25, 4  ;;  %s707_s26 = int_to_ptr.vmem [resolvable:$false] %s706_s26 }
  0x26   : > { %s708_s27 = scalar_lea.vmem %s707_s26, 1024  ;;  %p709_p9 = scmp.lt.s32.totalorder %s925_s4, %s707_s26 }
  0x27   : > { %p704_p5 = pnand %p702_p2, %p688_p3  ;;  %p710_p4 = scmp.lt.s32.totalorder %s708_s27, %s701_s20 }
  0x29   : > { %p705_p11 = pneg %p704_p5  ;;  %p711_p7 = por %p710_p4, %p709_p9 }
  0x2b   : > { %p712_p10 = pnand %p711_p7, %p705_p11 }
  0x2d   : > { %715 = shalt.err (!%p712_p10)
}
  0x2e   : > { %s833_s28 = smov 128   ;;  %s834_s29 = smov 8  }
  0x2f   : > { %624 = dma.hbm_to_vmem [thread:$0]  (!%p929_p0), %s923_s30, 512, %s925_s4, %s934_s6, %s833_s28, %s833_s28, %s834_s29  }
  0x30   : > { %p154_p12 = scmp.lt.s32.totalorder %s830_s14, 3  ;;  %p1131_p1 = scmp.ge.s32.totalorder %s830_s14, 1 }
  0x32   : > { %p155_p3 = pnand %p1131_p1, %p154_p12 }
  0x33   : > { %s966_s3 = sand.u32 (!%p155_p3), 1, %s814_s10  }
  0x34   : > { %158 = sbr.rel (%p155_p3) target bundleno = 296 (0x128), region = 24  ;;  %s969_s7 = sshll.u32 (!%p155_p3), %s966_s3, 5 }
  0x35   : > { %s161_s8 = scalar_lea.sflag (!%p155_p3), [#allocation3], %s966_s3  ;;  %s164_s15 = scalar_lea.vmem (!%p155_p3), [#allocation2], %s969_s7 }
  0x3b   : > { %797 = dma.done.wait (%p901_p8), %s161_s8, 512  }
  0x3c   : > { %799 = vsyncadd (%p901_p8), %s161_s8, 4294966784  ;;  %v200_v0 = vlaneseq  ;;  %vm218_vm0 = vcmask 130048   ;;  %v196_v4 = vld [vmem:[%s164_s15] sm:$0xff]  ;;  %v197_v5 = vld [vmem:[%s164_s15 + $0x8] sm:$0xff]  ;;  %s182_s21 = scalar_lea.vmem [#allocation5], %s969_s7  ;;  %s582_s30 = sshll.u32 %s822_s12, 9 }
  0x3d   : > { %v198_v6 = vld [vmem:[%s164_s15 + $0x10] sm:$0xff]  ;;  %v607_v7 = vpack.c.bf16 %v197_v5, %v196_v4  ;;  %v199_v8 = vld [vmem:[%s164_s15 + $0x18] sm:$0xff]  ;;  %597 = vmatprep.mubr.msk.f32.mxu0 %vm218_vm0, %v196_v4  ;;  %s1015_s6 = scalar_lea.hbm %s1123_s1, %s582_s30  ;;  %s415_s16 = sshll.u32 %s182_s21, 4  ;;  %s1017_s16 = int_to_ptr.vmem [resolvable:$true] %s415_s16 }
  0x3e   : > { %v977_v1 = vshrl.u32 %v200_v0, 7  ;;  %v979_v2 = vand.u32 127, %v200_v0  ;;  %604 = vmatprep.mubr.msk.f32.mxu1 %vm218_vm0, %v198_v6  ;;  %v611_v10 = vpack.c.bf16 %v199_v8, %v198_v6  ;;  %s394_s18 = scalar_lea.sflag [#allocation4], %s966_s3  ;;  %s716_s19 = scalar_lea.vmem %s1017_s16, 512 }
  0x3f   : > { %608 = vmatprep.subr.bf16.mxu0 %v607_v7  ;;  %p717_p8 = scmp.ne.s32.totalorder %s1017_s16, %s716_s19  ;;  %p1132_p9 = scmp.ne.s32.totalorder %s1128_s22, 0 }
  0x40   : > { %v982_v3 = vadd.s32 8, %v977_v1  ;;  %612 = vmatprep.subr.bf16.mxu1 %v611_v10  ;;  %610 = vmatpush3.bf16.msra.mxu0 %v607_v7  ;;  %vm208_vm2 = vcmp.ne.s32.totalorder %v977_v1, %v979_v2  ;;  %s835_s20 = smov [#allocation5]  }
  0x41   : > { %614 = vmatpush3.bf16.msra.mxu1 %v611_v10  ;;  %v214_v12 = vsel %vm208_vm2, %v196_v4, 0.0  ;;  %v216_v13 = vsel %vm208_vm2, %v198_v6, 0.0  ;;  %p718_p11 = pnand %p717_p8, %p1132_p9  ;;  %s720_s25 = sshll.u32 %s835_s20, 4  ;;  %s721_s25 = int_to_ptr.vmem [resolvable:$false] %s720_s25 }
  0x42   : > { %vm209_vm1 = vcmp.ne.s32.totalorder %v982_v3, %v979_v2  ;;  %219 = vst.msk [vmem:[%s182_s21] sm:$0xff] %vm218_vm0, %v214_v12  ;;  %221 = vst.msk [vmem:[%s182_s21 + $0x10] sm:$0xff] %vm218_vm0, %v216_v13  ;;  %s722_s26 = scalar_lea.vmem %s721_s25, 1024  ;;  %p723_p6 = scmp.lt.s32.totalorder %s1017_s16, %s721_s25 }
  0x43   : > { %v215_v9 = vsel %vm209_vm1, %v197_v5, 0.0  ;;  %v217_v11 = vsel %vm209_vm1, %v199_v8, 0.0  ;;  %598 = vmatmul.mubr.msk.f32.vlgmr.msra.gmra.mrb[0].mxu0 %vm218_vm0, %v197_v5  ;;  %p719_p0 = pneg %p718_p11  ;;  %p724_p13 = scmp.lt.s32.totalorder %s722_s26, %s716_s19 }
  0x44   : > { %220 = vst.msk [vmem:[%s182_s21 + $0x8] sm:$0xff] %vm218_vm0, %v215_v9  ;;  %222 = vst.msk [vmem:[%s182_s21 + $0x18] sm:$0xff] %vm218_vm0, %v217_v11  ;;  %605 = vmatmul.mubr.msk.f32.vlgmr.msra.gmra.mrb[0].mxu1 %vm218_vm0, %v199_v8 }
  0x45   : > { %p725_p2 = por %p724_p13, %p723_p6 }
  0x47   : > { %p726_p5 = pnand %p725_p2, %p719_p0 }
  0x49   : > { %729 = shalt.err (!%p726_p5)
}
  0x4a   : > { %s730_s27 = scalar_lea.hbm %s1015_s6, 512  ;;  %s734_s8 = scalar_lea.hbm %s1123_s1, 1024 }
  0x4b   : > { %p731_p4 = scmp.ne.s32.totalorder %s1015_s6, %s730_s27  ;;  %p735_p12 = scmp.lt.u32.totalorder %s1015_s6, %s1123_s1 }
  0x4c   : > { %p736_p1 = scmp.lt.u32.totalorder %s734_s8, %s730_s27  ;;  %p738_p8 = scmp.lt.u32.totalorder %s730_s27, %s1015_s6 }
  0x4d   : > { %p732_p7 = pnand %p731_p4, %p1132_p9 }
  0x4e   : > { %p737_p3 = por %p736_p1, %p735_p12 }
  0x4f   : > { %p733_p10 = pneg %p732_p7 }
  0x50   : > { %p739_p11 = por %p738_p8, %p737_p3 }
  0x52   : > { %p740_p0 = pnand %p739_p11, %p733_p10 }
  0x54   : > { %743 = shalt.err (!%p740_p0)
}
  0x55   : > { %s836_s4 = smov 128   ;;  %s837_s5 = smov 8  }
  0x56   : > { %617 = dma.vmem_to_hbm [thread:$0]  (%p1132_p9), %s1017_s16, 512, %s1015_s6, %s394_s18, %s836_s4, %s836_s4, %s837_s5  }
  0x57   : > { %s189_s19 = scalar_lea.vmem [#allocation6], %s969_s7  ;;  %s1064_s16 = scalar_lea.hbm %s1124_s2, %s582_s30 }
  0x58   : > { %s434_s20 = sshll.u32 %s189_s19, 4  ;;  %s399_s18 = scalar_lea.sflag [#allocation7], %s966_s3  ;;  %s1050_s20 = int_to_ptr.vmem [resolvable:$true] %s434_s20 }
  0x59   : > { %s744_s25 = scalar_lea.vmem %s1050_s20, 512  ;;  %s838_s12 = smov [#allocation6]  }
  0x5a   : > { %p745_p6 = scmp.ne.s32.totalorder %s1050_s20, %s744_s25  ;;  %s748_s26 = sshll.u32 %s838_s12, 4  ;;  %s749_s26 = int_to_ptr.vmem [resolvable:$false] %s748_s26 }
  0x5b   : > { %s750_s30 = scalar_lea.vmem %s749_s26, 1024  ;;  %p751_p5 = scmp.lt.s32.totalorder %s1050_s20, %s749_s26 }
  0x5c   : > { %p746_p13 = pnand %p745_p6, %p1132_p9  ;;  %p752_p4 = scmp.lt.s32.totalorder %s750_s30, %s744_s25 }
  0x5e   : > { %p747_p2 = pneg %p746_p13  ;;  %p753_p7 = por %p752_p4, %p751_p5 }
  0x60   : > { %p754_p10 = pnand %p753_p7, %p747_p2 }
 0x116   : > { %v599_v14 = vpop.f32.mrb[0].mxu0 }
 0x117   : > { %v386_v15 = vsel %vm209_vm1, %v599_v14, 0.0  ;;  %v606_v16 = vpop.f32.mrb[0].mxu1  ;;  %v295_v17 = vpop.f32.mrb[1].mxu0 }
 0x118   : > { %390 = vst.msk [vmem:[%s189_s19 + $0x8] sm:$0xff] %vm218_vm0, %v386_v15  ;;  %v388_v18 = vsel %vm209_vm1, %v606_v16, 0.0  ;;  %v385_v19 = vsel %vm208_vm2, %v295_v17, 0.0  ;;  %v376_v20 = vpop.f32.mrb[1].mxu1 }
 0x119   : > { %392 = vst.msk [vmem:[%s189_s19 + $0x18] sm:$0xff] %vm218_vm0, %v388_v18  ;;  %389 = vst.msk [vmem:[%s189_s19] sm:$0xff] %vm218_vm0, %v385_v19  ;;  %v387_v21 = vsel %vm208_vm2, %v376_v20, 0.0 }
 0x11a   : > { %391 = vst.msk [vmem:[%s189_s19 + $0x10] sm:$0xff] %vm218_vm0, %v387_v21 }
 0x11b   : > { %757 = shalt.err (!%p754_p10)
}
 0x11c   : > { %s758_s27 = scalar_lea.hbm %s1064_s16, 512  ;;  %s762_s8 = scalar_lea.hbm %s1124_s2, 1024 }
 0x11d   : > { %p759_p12 = scmp.ne.s32.totalorder %s1064_s16, %s758_s27  ;;  %p763_p8 = scmp.lt.u32.totalorder %s1064_s16, %s1124_s2 }
 0x11e   : > { %p764_p11 = scmp.lt.u32.totalorder %s762_s8, %s758_s27  ;;  %p766_p6 = scmp.lt.u32.totalorder %s758_s27, %s1064_s16 }
 0x11f   : > { %p760_p1 = pnand %p759_p12, %p1132_p9 }
 0x120   : > { %p765_p0 = por %p764_p11, %p763_p8 }
 0x121   : > { %p761_p3 = pneg %p760_p1 }
 0x122   : > { %p767_p13 = por %p766_p6, %p765_p0 }
 0x124   : > { %p768_p2 = pnand %p767_p13, %p761_p3 }
 0x126   : > { %771 = shalt.err (!%p768_p2)
}
 0x127   : > { %618 = dma.vmem_to_hbm [thread:$0]  (%p1132_p9), %s1050_s20, 512, %s1064_s16, %s399_s18, %s836_s4, %s836_s4, %s837_s5  }
 0x128 PF: > { %s449_s19 = sand.u32 1, %s810_s9   ;;  %p1133_p5 = scmp.ne.s32.totalorder %s1129_s24, 0 }
 0x129   : > { %p1134_p4 = scmp.ge.s32.totalorder %s830_s14, 2  ;;  %s450_s7 = scalar_lea.sflag [#allocation4], %s449_s19 }
 0x12b   : > { %p626_p7 = pnand %p1134_p4, %p1133_p5 }
 0x12d   : > { %801 = dma.done.wait (!%p626_p7), %s450_s7, 512  }
 0x12e   : > { %803 = vsyncadd (!%p626_p7), %s450_s7, 4294966784  ;;  %s459_s22 = scalar_lea.sflag [#allocation7], %s449_s19 }
 0x12f   : > { %805 = dma.done.wait (!%p626_p7), %s459_s22, 512  }
 0x130   : > { %807 = vsyncadd (!%p626_p7), %s459_s22, 4294966784  ;;  %s22_s14 = sadd.s32 1, %s830_s14   ;;  %s1135_s9 = smov %s814_s10 }
 0x131   : > { %p19_p10 = scmp.ge.s32.totalorder %s22_s14, 4   ;;  %s1136_s10 = smov %s818_s11 }
 0x132   : > { %s1137_s11 = smov %s910_s23  ;;  %s1138_s12 = smov %s826_s13 }
 0x133   : > { %s1139_s13 = smov %s1141_s17  ;;  %21 = sbr.rel (!%p19_p10) target bundleno = 8 (0x8), region = 86 }
 0x13a   :  { %464 = vsyncpa [#allocation3], 1 }
 0x13b   :  { %466 = vsyncpa [#allocation3 + $0x1], 1 }
 0x13c   :  { %467 = vsyncpa [#allocation4], 1 }
 0x13d   :  { %469 = vsyncpa [#allocation4 + $0x1], 1 }
 0x13e   :  { %470 = vsyncpa [#allocation7], 1 }
 0x13f   :  { %472 = vsyncpa [#allocation7 + $0x1], 1 }

</bundles_post_ra>
